<compile_context>
chip_gen: v6e
topology: v6e:2x2x1
jax: 0.10.0
libtpu: 0.0.40
codegen_flags: <defaults>
</compile_context>

<pallas_src>
import functools

import jax
import jax.numpy as jnp
from jax.experimental import pallas as pl
from jax.experimental.pallas import tpu as pltpu


def _ae_kernel(x_ref, we_ref, be_ref, wd_ref, bd_ref, recon_ref, fct_ref):
    # x_ref:     (tb, P)      streamed batch tile
    # we_ref:    (P, F_pad)   encoder weight^T, zero-padded cols (resident)
    # be_ref:    (1, F_pad)   encoder bias, zero-padded          (resident)
    # wd_ref:    (F_pad, P)   decoder weight^T, zero-padded rows (resident)
    # bd_ref:    (1, P)       decoder bias                       (resident)
    # recon_ref: (tb, P)      reconstruction output tile
    # fct_ref:   (tb, F)      factors output tile (unpadded -> no extra HBM pass)
    F = fct_ref.shape[-1]
    x = x_ref[...]

    # Encoder: accumulate in f32 on the MXU, then round to the output dtype
    # before the decoder so stored factors == factors the decoder consumes.
    factors_f32 = (
        jnp.dot(x, we_ref[...], preferred_element_type=jnp.float32)
        + be_ref[...].astype(jnp.float32)
    )
    factors = factors_f32.astype(fct_ref.dtype)      # (tb, F_pad); padded lanes are 0

    # Store only the real F lanes: the MXU-side padding is free, only the HBM
    # writeback of padded lanes would cost.
    fct_ref[...] = factors[:, :F]

    # Decoder: padded factor lanes are exactly zero and hit zero rows of wd_t,
    # so padding is a numerical no-op.
    recon = (
        jnp.dot(factors.astype(wd_ref.dtype), wd_ref[...],
                preferred_element_type=jnp.float32)
        + bd_ref[...].astype(jnp.float32)
    )
    recon_ref[...] = recon.astype(recon_ref.dtype)


def prepare_params(w_enc, b_enc, w_dec, b_dec, dtype=jnp.float32):
    """One-time weight prep (transpose + zero-pad + cast), hoisted out of forward.

    PyTorch layout in: w_enc (F, P), b_enc (F,), w_dec (P, F), b_dec (P,).
    Returns (we_t, be, wd_t, bd) in kernel layout.
    """
    F, P = w_enc.shape
    F_pad = ((F + 127) // 128) * 128
    we_t = jnp.zeros((P, F_pad), dtype).at[:, :F].set(w_enc.T.astype(dtype))
    be = jnp.zeros((1, F_pad), dtype).at[:, :F].set(b_enc.astype(dtype))
    wd_t = jnp.zeros((F_pad, P), dtype).at[:F, :].set(w_dec.T.astype(dtype))
    bd = b_dec.reshape(1, P).astype(dtype)
    return we_t, be, wd_t, bd


def _effective_block_b(B, block_b, itemsize):
    """Pick the batch-tile size (Python ints, trace time only)."""
    # Round to the dtype's sublane packing: 8 rows f32, 16 bf16, 32 int8/fp8.
    sub = 8 * max(1, 4 // max(1, itemsize))
    rup = lambda v: ((v + sub - 1) // sub) * sub
    bb = max(sub, min(block_b, rup(B)))
    # Large batches: keep >= 4 grid steps (>= 2 per v7x TensorCore once the
    # "parallel" axis is megacore-sharded) so each core still double-buffers;
    # don't shrink below 256 rows just for that.
    if B >= 4 * 256 and pl.cdiv(B, bb) < 4:
        bb = max(256, rup(pl.cdiv(B, 4)))
    return bb


@functools.partial(jax.jit, static_argnames=("nb_fctr", "block_b"))
def linear_autoencoder_forward(x, we_t, be, wd_t, bd, *, nb_fctr, block_b=2048):
    """x: (B, P). Weights must come from prepare_params(). Returns (recon, factors)."""
    B, P = x.shape
    F = nb_fctr
    F_pad = we_t.shape[1]
    dt = x.dtype
    itemsize = jnp.dtype(dt).itemsize

    bb = _effective_block_b(B, block_b, itemsize)
    grid = (pl.cdiv(B, bb),)

    # Honest VMEM budget: double-buffered streamed tiles (factors tile is
    # lane-padded to 128 in VMEM regardless of F) + double-buffered resident
    # weights + headroom. Cap at 48 MiB (v7x has 64 MiB physical per TC).
    tile_bytes = bb * (2 * P + max(F, 128)) * itemsize
    resident_bytes = (2 * P * F_pad + 8 * F_pad + 8 * P) * itemsize
    vmem_bytes = 2 * tile_bytes + 2 * resident_bytes + (4 << 20)
    vmem_bytes = int(min(max(vmem_bytes, 16 << 20), 48 << 20))

    recon, factors = pl.pallas_call(
        _ae_kernel,
        out_shape=(
            jax.ShapeDtypeStruct((B, P), dt),
            jax.ShapeDtypeStruct((B, F), dt),
        ),
        grid_spec=pltpu.PrefetchScalarGridSpec(
            num_scalar_prefetch=0,
            grid=grid,
            in_specs=[
                pl.BlockSpec((bb, P), lambda i: (i, 0)),       # x tile (streamed)
                pl.BlockSpec((P, F_pad), lambda i: (0, 0)),    # W_enc^T (resident)
                pl.BlockSpec((1, F_pad), lambda i: (0, 0)),    # b_enc   (resident)
                pl.BlockSpec((F_pad, P), lambda i: (0, 0)),    # W_dec^T (resident)
                pl.BlockSpec((1, P), lambda i: (0, 0)),        # b_dec   (resident)
            ],
            out_specs=[
                pl.BlockSpec((bb, P), lambda i: (i, 0)),       # recon tile
                pl.BlockSpec((bb, F), lambda i: (i, 0)),       # factors tile (no pad)
            ],
        ),
        compiler_params=pltpu.CompilerParams(
            dimension_semantics=("parallel",),
            vmem_limit_bytes=vmem_bytes,
        ),
    )(x, we_t, be, wd_t, bd)

    return recon, factors


def _init_linear_params(key, out_features, in_features, dtype=jnp.float32):
    # Mimic PyTorch nn.Linear default init: U(-1/sqrt(fan_in), 1/sqrt(fan_in))
    kw, kb = jax.random.split(key)
    bound = 1.0 / jnp.sqrt(jnp.asarray(in_features, dtype))
    w = jax.random.uniform(kw, (out_features, in_features), dtype, -bound, bound)
    b = jax.random.uniform(kb, (out_features,), dtype, -bound, bound)
    return w, b


def _reference(x, w_enc, b_enc, w_dec, b_dec):
    factors = x @ w_enc.T + b_enc
    recon = factors @ w_dec.T + b_dec
    return recon, factors


if __name__ == "__main__":
    # Small shapes consistent with the module: nb_managed_ptfs=128, nb_fctr=16
    P = 128          # nb_managed_ptfs
    F = 16           # nb_fctr

    key = jax.random.PRNGKey(0)
    kx, kenc, kdec, kx2 = jax.random.split(key, 4)

    w_enc, b_enc = _init_linear_params(kenc, F, P)   # encoder: Linear(P -> F)
    w_dec, b_dec = _init_linear_params(kdec, P, F)   # decoder: Linear(F -> P)

    # One-time weight prep, hoisted out of the per-call forward.
    params = prepare_params(w_enc, b_enc, w_dec, b_dec, jnp.float32)
    params = jax.block_until_ready(params)

    # --- Main run (single grid step) ---
    B = 64
    x = jax.random.normal(kx, (B, P), jnp.float32)
    recon, factors = linear_autoencoder_forward(x, *params, nb_fctr=F)
    jax.block_until_ready((recon, factors))

    recon_ref, factors_ref = _reference(x, w_enc, b_enc, w_dec, b_dec)
    assert recon.shape == (B, P) and factors.shape == (B, F)
    assert jnp.allclose(factors, factors_ref, atol=1e-4, rtol=1e-4)
    assert jnp.allclose(recon, recon_ref, atol=1e-4, rtol=1e-4)

    # --- Multi-step grid with a partial last tile (exercises masked writeback) ---
    B2 = 200
    x2 = jax.random.normal(kx2, (B2, P), jnp.float32)
    recon2, factors2 = linear_autoencoder_forward(
        x2, *params, nb_fctr=F, block_b=64
    )
    jax.block_until_ready((recon2, factors2))

    recon2_ref, factors2_ref = _reference(x2, w_enc, b_enc, w_dec, b_dec)
    assert recon2.shape == (B2, P) and factors2.shape == (B2, F)
    assert jnp.allclose(factors2, factors2_ref, atol=1e-4, rtol=1e-4)
    assert jnp.allclose(recon2, recon2_ref, atol=1e-4, rtol=1e-4)

    print("KERNEL_OK")
</pallas_src>

<mosaic_0001>
module attributes {stable_mosaic.version = 11 : i64} {
  func.func @_ae_kernel(%arg0: i32, %arg1: memref<64x128xf32, #tpu.memory_space<vmem>>, %arg2: memref<128x128xf32, #tpu.memory_space<vmem>>, %arg3: memref<1x128xf32, #tpu.memory_space<vmem>>, %arg4: memref<128x128xf32, #tpu.memory_space<vmem>>, %arg5: memref<1x128xf32, #tpu.memory_space<vmem>>, %arg6: memref<64x128xf32, #tpu.memory_space<vmem>>, %arg7: memref<64x16xf32, #tpu.memory_space<vmem>>) attributes {dimension_semantics = [#tpu.dimension_semantics<parallel>], iteration_bounds = array<i64: 1>, scalar_prefetch = 0 : i64, scratch_operands = 0 : i64, tpu.core_type = #tpu.core_type<tc>, window_params = [{transform_indices = @transform_0, window_bounds = array<i64: 64, 128>}, {pipeline_mode = #tpu.pipeline_mode<synchronous>, transform_indices = @transform_1, window_bounds = array<i64: 128, 128>}, {pipeline_mode = #tpu.pipeline_mode<synchronous>, transform_indices = @transform_2, window_bounds = array<i64: 1, 128>}, {pipeline_mode = #tpu.pipeline_mode<synchronous>, transform_indices = @transform_3, window_bounds = array<i64: 128, 128>}, {pipeline_mode = #tpu.pipeline_mode<synchronous>, transform_indices = @transform_4, window_bounds = array<i64: 1, 128>}, {transform_indices = @transform_5, window_bounds = array<i64: 64, 128>}, {transform_indices = @transform_6, window_bounds = array<i64: 64, 16>}]} {
    %c0 = arith.constant 0 : index
    %c0_0 = arith.constant 0 : index
    %0 = vector.load %arg1[%c0, %c0_0] : memref<64x128xf32, #tpu.memory_space<vmem>>, vector<64x128xf32>
    %c0_1 = arith.constant 0 : index
    %c0_2 = arith.constant 0 : index
    %1 = vector.load %arg2[%c0_1, %c0_2] : memref<128x128xf32, #tpu.memory_space<vmem>>, vector<128x128xf32>
    %cst = arith.constant dense<0.000000e+00> : vector<64x128xf32>
    %2 = tpu.matmul %0, %1, %cst {dimension_numbers = #tpu.dot_dimension_numbers<[1], [0], [0], [1], [0, 0, 1, 1], [], []>} : vector<64x128xf32>, vector<128x128xf32>, vector<64x128xf32> -> vector<64x128xf32>
    %c0_3 = arith.constant 0 : index
    %c0_4 = arith.constant 0 : index
    %3 = vector.load %arg3[%c0_3, %c0_4] : memref<1x128xf32, #tpu.memory_space<vmem>>, vector<1x128xf32>
    %4 = vector.broadcast %3 : vector<1x128xf32> to vector<64x128xf32>
    %5 = arith.addf %2, %4 : vector<64x128xf32>
    %6 = vector.extract_strided_slice %5 {offsets = [0, 0], sizes = [64, 16], strides = [1, 1]} : vector<64x128xf32> to vector<64x16xf32>
    %c0_5 = arith.constant 0 : index
    %c0_6 = arith.constant 0 : index
    %7 = vector.load %arg7[%c0_5, %c0_6] : memref<64x16xf32, #tpu.memory_space<vmem>>, vector<64x16xf32>
    tpu.vector_store %arg7[%c0_5, %c0_6], %6 {strides = array<i32>} : memref<64x16xf32, #tpu.memory_space<vmem>>, vector<64x16xf32>,
    %c0_7 = arith.constant 0 : index
    %c0_8 = arith.constant 0 : index
    %8 = vector.load %arg4[%c0_7, %c0_8] : memref<128x128xf32, #tpu.memory_space<vmem>>, vector<128x128xf32>
    %cst_9 = arith.constant dense<0.000000e+00> : vector<64x128xf32>
    %9 = tpu.matmul %5, %8, %cst_9 {dimension_numbers = #tpu.dot_dimension_numbers<[1], [0], [0], [1], [0, 0, 1, 1], [], []>} : vector<64x128xf32>, vector<128x128xf32>, vector<64x128xf32> -> vector<64x128xf32>
    %c0_10 = arith.constant 0 : index
    %c0_11 = arith.constant 0 : index
    %10 = vector.load %arg5[%c0_10, %c0_11] : memref<1x128xf32, #tpu.memory_space<vmem>>, vector<1x128xf32>
    %11 = vector.broadcast %10 : vector<1x128xf32> to vector<64x128xf32>
    %12 = arith.addf %9, %11 : vector<64x128xf32>
    %c0_12 = arith.constant 0 : index
    %c0_13 = arith.constant 0 : index
    %13 = vector.load %arg6[%c0_12, %c0_13] : memref<64x128xf32, #tpu.memory_space<vmem>>, vector<64x128xf32>
    tpu.vector_store %arg6[%c0_12, %c0_13], %12 {strides = array<i32>} : memref<64x128xf32, #tpu.memory_space<vmem>>, vector<64x128xf32>,
    return
  }
  func.func @transform_0(%arg0: i32) -> (i32, i32) {
    %c0_i32 = arith.constant 0 : i32
    %c0_i32_0 = arith.constant 0 : i32
    return %arg0, %c0_i32 : i32, i32
  }
  func.func @transform_1(%arg0: i32) -> (i32, i32) {
    %c0_i32 = arith.constant 0 : i32
    %c0_i32_0 = arith.constant 0 : i32
    %c0_i32_1 = arith.constant 0 : i32
    return %c0_i32, %c0_i32_0 : i32, i32
  }
  func.func @transform_2(%arg0: i32) -> (i32, i32) {
    %c0_i32 = arith.constant 0 : i32
    %c0_i32_0 = arith.constant 0 : i32
    %c0_i32_1 = arith.constant 0 : i32
    return %c0_i32, %c0_i32_0 : i32, i32
  }
  func.func @transform_3(%arg0: i32) -> (i32, i32) {
    %c0_i32 = arith.constant 0 : i32
    %c0_i32_0 = arith.constant 0 : i32
    %c0_i32_1 = arith.constant 0 : i32
    return %c0_i32, %c0_i32_0 : i32, i32
  }
  func.func @transform_4(%arg0: i32) -> (i32, i32) {
    %c0_i32 = arith.constant 0 : i32
    %c0_i32_0 = arith.constant 0 : i32
    %c0_i32_1 = arith.constant 0 : i32
    return %c0_i32, %c0_i32_0 : i32, i32
  }
  func.func @transform_5(%arg0: i32) -> (i32, i32) {
    %c0_i32 = arith.constant 0 : i32
    %c0_i32_0 = arith.constant 0 : i32
    return %arg0, %c0_i32 : i32, i32
  }
  func.func @transform_6(%arg0: i32) -> (i32, i32) {
    %c0_i32 = arith.constant 0 : i32
    %c0_i32_0 = arith.constant 0 : i32
    return %arg0, %c0_i32 : i32, i32
  }
}

</mosaic_0001>

<bundles_post_ra>
// kernel: linear_autoencoder_forward.1
= control target key start
LH: loop header
LB: loop body
LE: loop exit
PB: predicated region body
PF: predicated region fallthrough
CT: control target
= control target key end

     0   :  { %12 = vsyncpa [#allocation3], 0  ;;  %s700_s0 = inlined_call_operand.hbm [shape: f32[64,128], index: 0, kind: input, shape index: {}]   ;;  %s701_s1 = inlined_call_operand.hbm [shape: f32[128,128], index: 1, kind: input, shape index: {}]   ;;  %s702_s2 = inlined_call_operand.vmem [shape: f32[1,128], index: 2, kind: input, shape index: {}]   ;;  %s703_s3 = inlined_call_operand.hbm [shape: f32[128,128], index: 3, kind: input, shape index: {}]   ;;  %s704_s4 = inlined_call_operand.vmem [shape: f32[1,128], index: 4, kind: input, shape index: {}]   ;;  %s705_s5 = inlined_call_operand.hbm [shape: f32[64,128], index: 5, kind: output, shape index: {0}]   ;;  %s706_s6 = inlined_call_operand.vmem [shape: f32[64,16], index: 6, kind: output, shape index: {1}]  }
   0x1   :  { %13 = vsyncpa [#allocation6], 0 }
   0x2   :  { %14 = vsyncpa [#allocation4], 0  ;;  %s597_s21 = smov [#allocation5]   ;;  %s598_s23 = smov [#allocation2]  }
   0x3   :  { %s32_s22 = sshll.u32 %s597_s21, 4  ;;  %s20_s24 = sshll.u32 %s598_s23, 4  ;;  %s33_s22 = int_to_ptr.vmem [resolvable:$true] %s32_s22  ;;  %s21_s24 = int_to_ptr.vmem [resolvable:$true] %s20_s24 }
   0x4   :  { %s519_s25 = scalar_lea.vmem %s33_s22, 2048  ;;  %p524_p1 = scmp.lt.s32.totalorder %s33_s22, %s33_s22 }
   0x5   :  { %p520_p0 = scmp.ne.s32.totalorder %s33_s22, %s519_s25  ;;  %p525_p2 = scmp.lt.s32.totalorder %s519_s25, %s519_s25 }
   0x7   :  { %p526_p3 = por %p525_p2, %p524_p1 }
   0x9   :  { %p527_p4 = pnand %p526_p3, %p520_p0 }
   0xb   :  { %530 = shalt.err (!%p527_p4)
}
   0xc   :  { %s599_s26 = smov 128   ;;  %s600_s27 = smov 8  }
   0xd   :  { %38 = dma.hbm_to_vmem [thread:$0]  %s701_s1, 2048, %s33_s22, [#allocation6], %s599_s26, %s599_s26, %s600_s27  }
   0xe   :  { %s539_s30 = scalar_lea.vmem %s21_s24, 1024  ;;  %p544_p6 = scmp.lt.s32.totalorder %s21_s24, %s21_s24 }
   0xf   :  { %p540_p5 = scmp.ne.s32.totalorder %s21_s24, %s539_s30  ;;  %p545_p7 = scmp.lt.s32.totalorder %s539_s30, %s539_s30 }
  0x11   :  { %p546_p8 = por %p545_p7, %p544_p6 }
  0x13   :  { %p547_p9 = pnand %p546_p8, %p540_p5 }
  0x15   :  { %550 = shalt.err (!%p547_p9)
}
  0x16   :  { %26 = dma.hbm_to_vmem [thread:$0]  %s700_s0, 1024, %s21_s24, [#allocation3], %s599_s26, %s599_s26, %s600_s27  }
  0x17   :  { %s601_s9 = smov [#allocation7]  }
  0x18   :  { %s46_s10 = sshll.u32 %s601_s9, 4  ;;  %s47_s10 = int_to_ptr.vmem [resolvable:$true] %s46_s10 }
  0x19   :  { %s559_s11 = scalar_lea.vmem %s47_s10, 2048  ;;  %p564_p11 = scmp.lt.s32.totalorder %s47_s10, %s47_s10 }
  0x1a   :  { %p560_p10 = scmp.ne.s32.totalorder %s47_s10, %s559_s11  ;;  %p565_p12 = scmp.lt.s32.totalorder %s559_s11, %s559_s11 }
  0x1c   :  { %p566_p13 = por %p565_p12, %p564_p11 }
  0x1e   :  { %p567_p0 = pnand %p566_p13, %p560_p10 }
  0x20   :  { %570 = shalt.err (!%p567_p0)
}
  0x21   :  { %52 = dma.hbm_to_vmem [thread:$0]  %s703_s3, 2048, %s47_s10, [#allocation6], %s599_s26, %s599_s26, %s600_s27  }
  0x22   :  { %591 = dma.done.wait [#allocation3], 1024  }
  0x23   :  { %592 = vsyncadd [#allocation3], 4294966272 }
  0x24   :  { %593 = dma.done.wait [#allocation6], 4096  }
  0x25   :  { %594 = vsyncadd [#allocation6], 4294963200  ;;  %v87_v0 = vld [vmem:[#allocation5 + $0x78] sm:$0xff]  ;;  %v86_v1 = vld [vmem:[#allocation5 + $0x70] sm:$0xff]  ;;  %vm200_vm0 = vcmask 130048  }
  0x26   :  { %417 = vmatprep.subr.mxu0 %v87_v0  ;;  %v85_v2 = vld [vmem:[#allocation5 + $0x68] sm:$0xff]  ;;  %v84_v3 = vld [vmem:[#allocation5 + $0x60] sm:$0xff]  ;;  %v83_v5 = vld [vmem:[#allocation5 + $0x58] sm:$0xff] }
  0x27   :  { %418 = vmatpush3.msra.mxu0 %v87_v0  ;;  %v64_v4 = vld [vmem:[#allocation2] sm:$0xff]  ;;  %v82_v6 = vld [vmem:[#allocation5 + $0x50] sm:$0xff]  ;;  %v224_v7 = vld [vmem:[#allocation7 + $0x78] sm:$0xff] }
  0x28   :  { %419 = vmatprep.subr.mxu0 %v86_v1  ;;  %449 = vmatprep.mubr.f32.mxu0 %v64_v4  ;;  %v223_v8 = vld [vmem:[#allocation7 + $0x70] sm:$0xff]  ;;  %v81_v9 = vld [vmem:[#allocation5 + $0x48] sm:$0xff]  ;;  %v80_v11 = vld [vmem:[#allocation5 + $0x40] sm:$0xff] }
  0x29   :  { %420 = vmatpush3.msra.mxu0 %v86_v1  ;;  %461 = vmatprep.subr.mxu1 %v224_v7  ;;  %v222_v10 = vld [vmem:[#allocation7 + $0x68] sm:$0xff]  ;;  %v221_v12 = vld [vmem:[#allocation7 + $0x60] sm:$0xff]  ;;  %v79_v13 = vld [vmem:[#allocation5 + $0x38] sm:$0xff] }
  0x2a   :  { %421 = vmatprep.subr.mxu0 %v85_v2  ;;  %462 = vmatpush3.msra.mxu1 %v224_v7  ;;  %v220_v14 = vld [vmem:[#allocation7 + $0x58] sm:$0xff]  ;;  %v78_v15 = vld [vmem:[#allocation5 + $0x30] sm:$0xff]  ;;  %v77_v17 = vld [vmem:[#allocation5 + $0x28] sm:$0xff] }
  0x2b   :  { %422 = vmatpush3.msra.mxu0 %v85_v2  ;;  %463 = vmatprep.subr.mxu1 %v223_v8  ;;  %v219_v16 = vld [vmem:[#allocation7 + $0x50] sm:$0xff]  ;;  %v218_v18 = vld [vmem:[#allocation7 + $0x48] sm:$0xff]  ;;  %v76_v19 = vld [vmem:[#allocation5 + $0x20] sm:$0xff] }
  0x2c   :  { %423 = vmatprep.subr.mxu0 %v84_v3  ;;  %464 = vmatpush3.msra.mxu1 %v223_v8  ;;  %v217_v20 = vld [vmem:[#allocation7 + $0x40] sm:$0xff]  ;;  %v75_v21 = vld [vmem:[#allocation5 + $0x18] sm:$0xff]  ;;  %v74_v23 = vld [vmem:[#allocation5 + $0x10] sm:$0xff] }
  0x2d   :  { %424 = vmatpush3.msra.mxu0 %v84_v3  ;;  %465 = vmatprep.subr.mxu1 %v222_v10  ;;  %v216_v22 = vld [vmem:[#allocation7 + $0x38] sm:$0xff]  ;;  %v215_v24 = vld [vmem:[#allocation7 + $0x30] sm:$0xff]  ;;  %v73_v25 = vld [vmem:[#allocation5 + $0x8] sm:$0xff] }
  0x2e   :  { %425 = vmatprep.subr.mxu0 %v83_v5  ;;  %466 = vmatpush3.msra.mxu1 %v222_v10  ;;  %v214_v26 = vld [vmem:[#allocation7 + $0x28] sm:$0xff]  ;;  %v72_v27 = vld [vmem:[#allocation5] sm:$0xff]  ;;  %v212_v30 = vld [vmem:[#allocation7 + $0x18] sm:$0xff] }
  0x2f   :  { %426 = vmatpush3.msra.mxu0 %v83_v5  ;;  %467 = vmatprep.subr.mxu1 %v221_v12  ;;  %v213_v28 = vld [vmem:[#allocation7 + $0x20] sm:$0xff]  ;;  %v65_v29 = vld [vmem:[#allocation2 + $0x8] sm:$0xff]  ;;  %v66_v31 = vld [vmem:[#allocation2 + $0x10] sm:$0xff] }
  0x30   :  { %427 = vmatprep.subr.mxu0 %v82_v6  ;;  %468 = vmatpush3.msra.mxu1 %v221_v12  ;;  %v67_v32 = vld [vmem:[#allocation2 + $0x18] sm:$0xff]  ;;  %v68_v33 = vld [vmem:[#allocation2 + $0x20] sm:$0xff]  ;;  %v69_v34 = vld [vmem:[#allocation2 + $0x28] sm:$0xff] }
  0x31   :  { %428 = vmatpush3.msra.mxu0 %v82_v6  ;;  %469 = vmatprep.subr.mxu1 %v220_v14  ;;  %v70_v35 = vld [vmem:[#allocation2 + $0x30] sm:$0xff]  ;;  %v71_v36 = vld [vmem:[#allocation2 + $0x38] sm:$0xff]  ;;  %v210_v38 = vld [vmem:[#allocation7 + $0x8] sm:$0xff] }
  0x32   :  { %429 = vmatprep.subr.mxu0 %v81_v9  ;;  %470 = vmatpush3.msra.mxu1 %v220_v14  ;;  %v211_v37 = vld [vmem:[#allocation7 + $0x10] sm:$0xff]  ;;  %v209_v39 = vld [vmem:[#allocation7] sm:$0xff] }
  0x33   :  { %430 = vmatpush3.msra.mxu0 %v81_v9  ;;  %471 = vmatprep.subr.mxu1 %v219_v16  ;;  %v367_v40 = vld [vmem:[%s702_s2] ss:$0 sm:$0xff] }
  0x34   :  { %431 = vmatprep.subr.mxu0 %v80_v11  ;;  %472 = vmatpush3.msra.mxu1 %v219_v16  ;;  %v368_v57 = vld [vmem:[%s704_s4] ss:$0 sm:$0xff] }
  0x35   :  { %432 = vmatpush3.msra.mxu0 %v80_v11  ;;  %473 = vmatprep.subr.mxu1 %v218_v18 }
  0x36   :  { %433 = vmatprep.subr.mxu0 %v79_v13  ;;  %474 = vmatpush3.msra.mxu1 %v218_v18 }
  0x37   :  { %434 = vmatpush3.msra.mxu0 %v79_v13  ;;  %475 = vmatprep.subr.mxu1 %v217_v20 }
  0x38   :  { %435 = vmatprep.subr.mxu0 %v78_v15  ;;  %476 = vmatpush3.msra.mxu1 %v217_v20 }
  0x39   :  { %436 = vmatpush3.msra.mxu0 %v78_v15  ;;  %477 = vmatprep.subr.mxu1 %v216_v22 }
  0x3a   :  { %437 = vmatprep.subr.mxu0 %v77_v17  ;;  %478 = vmatpush3.msra.mxu1 %v216_v22 }
  0x3b   :  { %438 = vmatpush3.msra.mxu0 %v77_v17  ;;  %479 = vmatprep.subr.mxu1 %v215_v24 }
  0x3c   :  { %439 = vmatprep.subr.mxu0 %v76_v19  ;;  %480 = vmatpush3.msra.mxu1 %v215_v24 }
  0x3d   :  { %440 = vmatpush3.msra.mxu0 %v76_v19  ;;  %481 = vmatprep.subr.mxu1 %v214_v26 }
  0x3e   :  { %441 = vmatprep.subr.mxu0 %v75_v21  ;;  %482 = vmatpush3.msra.mxu1 %v214_v26 }
  0x3f   :  { %442 = vmatpush3.msra.mxu0 %v75_v21  ;;  %483 = vmatprep.subr.mxu1 %v213_v28 }
  0x40   :  { %443 = vmatprep.subr.mxu0 %v74_v23  ;;  %484 = vmatpush3.msra.mxu1 %v213_v28 }
  0x41   :  { %444 = vmatpush3.msra.mxu0 %v74_v23  ;;  %485 = vmatprep.subr.mxu1 %v212_v30 }
  0x42   :  { %445 = vmatprep.subr.mxu0 %v73_v25  ;;  %486 = vmatpush3.msra.mxu1 %v212_v30 }
  0x43   :  { %446 = vmatpush3.msra.mxu0 %v73_v25  ;;  %487 = vmatprep.subr.mxu1 %v211_v37 }
  0x44   :  { %447 = vmatprep.subr.mxu0 %v72_v27  ;;  %488 = vmatpush3.msra.mxu1 %v211_v37 }
  0x45   :  { %448 = vmatpush3.msra.mxu0 %v72_v27  ;;  %489 = vmatprep.subr.mxu1 %v210_v38 }
  0x46   :  { %450 = vmatmul.mubr.f32.vlgmr.msra.gmra.mxu0 %v65_v29  ;;  %490 = vmatpush3.msra.mxu1 %v210_v38 }
  0x47   :  { %452 = vmatprep.mubr.f32.mxu0 %v66_v31  ;;  %491 = vmatprep.subr.mxu1 %v209_v39 }
  0x48   :  { %492 = vmatpush3.msra.mxu1 %v209_v39 }
  0x4a   :  { %453 = vmatmul.mubr.f32.gmra.mxu0 %v67_v32 }
  0x4b   :  { %455 = vmatprep.mubr.f32.mxu0 %v68_v33 }
  0x4e   :  { %456 = vmatmul.mubr.f32.gmra.mxu0 %v69_v34 }
  0x4f   :  { %458 = vmatprep.mubr.f32.mxu0 %v70_v35 }
  0x52   :  { %459 = vmatmul.mubr.f32.gmra.mxu0 %v71_v36 }
 0x106   :  { %v451_v41 = vpop.f32.mrf.mxu0 }
 0x107   :  { %v167_v42 = vadd.f32 %v451_v41, %v367_v40 }
 0x108   :  { %v161_v43 = vpop.f32.mrf.mxu0 }
 0x109   :  { %202 = vst.msk [vmem:[%s706_s6 + $0x8] sm:$0xff] %vm200_vm0, %v167_v42  ;;  %v162_v44 = vadd.f32 %v367_v40, %v161_v43 }
 0x10a   :  { %v454_v45 = vpop.f32.mrf.mxu0 }
 0x10b   :  { %201 = vst.msk [vmem:[%s706_s6] sm:$0xff] %vm200_vm0, %v162_v44  ;;  %v177_v46 = vadd.f32 %v454_v45, %v367_v40  ;;  %493 = vmatprep.mubr.f32.mxu1 %v162_v44 }
 0x10c   :  { %v171_v47 = vpop.f32.mrf.mxu0  ;;  %494 = vmatmul.mubr.f32.vlgmr.msra.gmra.mxu1 %v167_v42 }
 0x10d   :  { %204 = vst.msk [vmem:[%s706_s6 + $0x18] sm:$0xff] %vm200_vm0, %v177_v46  ;;  %v172_v48 = vadd.f32 %v367_v40, %v171_v47 }
 0x10e   :  { %v457_v49 = vpop.f32.mrf.mxu0 }
 0x10f   :  { %203 = vst.msk [vmem:[%s706_s6 + $0x10] sm:$0xff] %vm200_vm0, %v172_v48  ;;  %v187_v50 = vadd.f32 %v457_v49, %v367_v40  ;;  %496 = vmatprep.mubr.f32.mxu1 %v172_v48 }
 0x110   :  { %v181_v51 = vpop.f32.mrf.mxu0  ;;  %497 = vmatmul.mubr.f32.gmra.mxu1 %v177_v46 }
 0x111   :  { %206 = vst.msk [vmem:[%s706_s6 + $0x28] sm:$0xff] %vm200_vm0, %v187_v50  ;;  %v182_v52 = vadd.f32 %v367_v40, %v181_v51 }
 0x112   :  { %v460_v53 = vpop.f32.mrf.mxu0 }
 0x113   :  { %205 = vst.msk [vmem:[%s706_s6 + $0x20] sm:$0xff] %vm200_vm0, %v182_v52  ;;  %v197_v54 = vadd.f32 %v460_v53, %v367_v40  ;;  %499 = vmatprep.mubr.f32.mxu1 %v182_v52 }
 0x114   :  { %v191_v55 = vpop.f32.mrf.mxu0  ;;  %500 = vmatmul.mubr.f32.gmra.mxu1 %v187_v50 }
 0x115   :  { %208 = vst.msk [vmem:[%s706_s6 + $0x38] sm:$0xff] %vm200_vm0, %v197_v54  ;;  %v192_v56 = vadd.f32 %v367_v40, %v191_v55 }
 0x117   :  { %207 = vst.msk [vmem:[%s706_s6 + $0x30] sm:$0xff] %vm200_vm0, %v192_v56  ;;  %502 = vmatprep.mubr.f32.mxu1 %v192_v56  ;;  %s602_s6 = smov [#allocation8]  }
 0x118   :  { %503 = vmatmul.mubr.f32.gmra.mxu1 %v197_v54  ;;  %s350_s4 = sshll.u32 %s602_s6, 4  ;;  %s351_s4 = int_to_ptr.vmem [resolvable:$true] %s350_s4 }
 0x119   :  { %s571_s8 = scalar_lea.vmem %s351_s4, 1024  ;;  %p576_p2 = scmp.lt.s32.totalorder %s351_s4, %s351_s4 }
 0x11a   :  { %p572_p1 = scmp.ne.s32.totalorder %s351_s4, %s571_s8  ;;  %p577_p3 = scmp.lt.s32.totalorder %s571_s8, %s571_s8 }
 0x11c   :  { %p578_p4 = por %p577_p3, %p576_p2 }
 0x11e   :  { %p579_p5 = pnand %p578_p4, %p572_p1 }
 0x1cc   :  { %v495_v58 = vpop.f32.mrf.mxu1 }
 0x1cd   :  { %v304_v59 = vadd.f32 %v495_v58, %v368_v57 }
 0x1ce   :  { %v298_v60 = vpop.f32.mrf.mxu1 }
 0x1cf   :  { %338 = vst [vmem:[#allocation8 + $0x8] sm:$0xff] %v304_v59  ;;  %v299_v61 = vadd.f32 %v368_v57, %v298_v60 }
 0x1d0   :  { %v498_v62 = vpop.f32.mrf.mxu1 }
 0x1d1   :  { %337 = vst [vmem:[#allocation8] sm:$0xff] %v299_v61  ;;  %v314_v63 = vadd.f32 %v498_v62, %v368_v57 }
 0x1d2   :  { %v308_v0 = vpop.f32.mrf.mxu1 }
 0x1d3   :  { %340 = vst [vmem:[#allocation8 + $0x18] sm:$0xff] %v314_v63  ;;  %v309_v1 = vadd.f32 %v368_v57, %v308_v0 }
 0x1d4   :  { %v501_v2 = vpop.f32.mrf.mxu1 }
 0x1d5   :  { %339 = vst [vmem:[#allocation8 + $0x10] sm:$0xff] %v309_v1  ;;  %v324_v3 = vadd.f32 %v501_v2, %v368_v57 }
 0x1d6   :  { %v318_v4 = vpop.f32.mrf.mxu1 }
 0x1d7   :  { %342 = vst [vmem:[#allocation8 + $0x28] sm:$0xff] %v324_v3  ;;  %v319_v5 = vadd.f32 %v368_v57, %v318_v4 }
 0x1d8   :  { %v504_v6 = vpop.f32.mrf.mxu1 }
 0x1d9   :  { %341 = vst [vmem:[#allocation8 + $0x20] sm:$0xff] %v319_v5  ;;  %v334_v7 = vadd.f32 %v504_v6, %v368_v57 }
 0x1da   :  { %v328_v8 = vpop.f32.mrf.mxu1 }
 0x1db   :  { %344 = vst [vmem:[#allocation8 + $0x38] sm:$0xff] %v334_v7  ;;  %v329_v9 = vadd.f32 %v368_v57, %v328_v8 }
 0x1dd   :  { %343 = vst [vmem:[#allocation8 + $0x30] sm:$0xff] %v329_v9 }
 0x1de   :  { %582 = shalt.err (!%p579_p5)
}
 0x1df   :  { %356 = dma.vmem_to_hbm [thread:$0]  %s351_s4, 1024, %s705_s5, [#allocation4], %s599_s26, %s599_s26, %s600_s27  }
 0x1e0   :  { %595 = dma.done.wait [#allocation4], 1024  }
 0x1e1   :  { %596 = vsyncadd [#allocation4], 4294966272 }
 0x1e2   :  { %364 = vsyncpa [#allocation3], 1 }
 0x1e3   :  { %365 = vsyncpa [#allocation6], 1 }
 0x1e4   :  { %366 = vsyncpa [#allocation4], 1 }

</bundles_post_ra>
